<compile_context>
chip_gen: v5e
topology: v5e:2x2
jax: 0.10.0
libtpu: 0.0.40
codegen_flags: <defaults>
</compile_context>

<pallas_src>
import jax
import jax.numpy as jnp
from jax.experimental import pallas as pl
from jax.experimental.pallas import tpu as pltpu


def _vmem_limit_bytes() -> int:
    """Per-generation VMEM request: ~75% of physical capacity (leaves headroom
    for compiler-internal scratch / semaphores). ~48 MiB on v7x, ~96 MiB on
    v5e/v6e. Falls back to the most conservative (v7x) capacity if the query
    is unavailable."""
    cap = 64 * 1024 * 1024
    try:
        info = pltpu.get_tpu_info()
        cap = int(getattr(info, "vmem_capacity_bytes", cap))
    except Exception:
        pass
    return (cap * 3) // 4


def _choose_tq(seq_len: int, num_heads: int, head_dim: int, emit_attn: bool,
               attn_bytes: int, vmem_limit: int) -> int:
    """Largest query tile (multiple of 8 dividing S, capped at 256 = MXU width)
    whose full per-step VMEM footprint fits inside the requested limit."""
    hd = num_heads * head_dim
    if seq_len % 8 != 0:
        # TODO(synk): no sub-tiling fallback when S is not a multiple of 8; for
        # very large such S the single full-extent block may exceed VMEM.
        return seq_len

    # TQ-independent footprint (bf16 activations/weights, f32 bias).
    fixed = (2 * seq_len * hd * 2        # key_value input block (double-buffered, bf16)
             + hd * 3 * hd * 2           # fused W_qkv (single-buffered, bf16)
             + 3 * hd * 4                # fused b_qkv (f32)
             + 2 * seq_len * hd * 2)     # K/V head-major VMEM scratch (bf16)
    budget = vmem_limit - fixed

    best = 8
    tq = 8
    while tq <= min(seq_len, 256):
        if seq_len % tq == 0:
            per_tile = (2 * tq * hd * 2                              # query block (bf16, x2)
                        + 2 * tq * hd * 4                            # output block (f32, x2)
                        + num_heads * tq * seq_len * (2 * 4 + 2)     # live f32 softmax + bf16 PV copy
                        + tq * hd * 4)                               # (H,TQ,D) f32 PV accumulator
            if emit_attn:
                per_tile += 2 * num_heads * tq * seq_len * attn_bytes  # attn-weights out block (x2)
            if per_tile <= budget:
                best = tq
        tq += 8
    return best


def _make_kernel(num_heads: int, head_dim: int, tq: int, seq_len: int,
                 compute_dtype, emit_attn: bool):
    hd = num_heads * head_dim
    scale = head_dim ** (-0.5)
    cdt = compute_dtype

    def body(xq_ref, xkv_ref, w_ref, b_ref, out_ref, attnw_ref, kh_scr, vh_scr):
        # ---- K/V projection: once per batch element, cached head-major in VMEM ----
        @pl.when(pl.program_id(1) == 0)
        def _():
            kv = (jnp.dot(xkv_ref[0], w_ref[:, hd:],
                          preferred_element_type=jnp.float32)
                  + b_ref[:, hd:]).astype(cdt)                               # (S, 2*Hd)
            kh_scr[...] = pltpu.einshape(
                "shd->hsd", kv[:, :hd].reshape(seq_len, num_heads, head_dim))
            vh_scr[...] = pltpu.einshape(
                "shd->hsd", kv[:, hd:].reshape(seq_len, num_heads, head_dim))

        # ---- Q projection for this tile; scale q once (TQ*Hd muls, not TQ*S) ----
        q = (jnp.dot(xq_ref[0], w_ref[:, :hd],
                     preferred_element_type=jnp.float32) + b_ref[:, :hd]) * scale
        qh = pltpu.einshape("qhd->hqd",
                            q.astype(cdt).reshape(tq, num_heads, head_dim))  # (H, TQ, D)

        # ---- Scores + softmax (f32 accumulation, exact normalization) ----
        scores = jnp.einsum('hqd,hkd->hqk', qh, kh_scr[...],
                            preferred_element_type=jnp.float32)              # (H, TQ, S)
        p = jnp.exp(scores - jnp.max(scores, axis=-1, keepdims=True))
        attn = p / jnp.sum(p, axis=-1, keepdims=True)                        # (H, TQ, S)
        if attnw_ref is not None:
            attnw_ref[0] = attn.astype(attnw_ref.dtype)

        # ---- attn @ V, assemble (TQ, Hd), single lane-dense store ----
        o = jnp.einsum('hqk,hkd->hqd', attn.astype(cdt), vh_scr[...],
                       preferred_element_type=jnp.float32)                   # (H, TQ, D)
        out_ref[0] = pltpu.einshape("hqd->qhd", o).reshape(tq, hd).astype(out_ref.dtype)

    if emit_attn:
        def kernel(xq_ref, xkv_ref, w_ref, b_ref, out_ref, attnw_ref, kh_scr, vh_scr):
            body(xq_ref, xkv_ref, w_ref, b_ref, out_ref, attnw_ref, kh_scr, vh_scr)
    else:
        def kernel(xq_ref, xkv_ref, w_ref, b_ref, out_ref, kh_scr, vh_scr):
            body(xq_ref, xkv_ref, w_ref, b_ref, out_ref, None, kh_scr, vh_scr)
    return kernel


def consciousness_attention(query, key_value, params, *, num_heads, head_dim,
                            compute_dtype=jnp.bfloat16,
                            return_attention_weights=True,
                            attn_weights_dtype=jnp.float32):
    """query, key_value: (B, S, H*D) float32.  params = (w_qkv, b_qkv) with
    w_qkv: (Hd, 3*Hd) = [Wq | Wk | Wv] (pre-transposed, in x out) and
    b_qkv: (1, 3*Hd) = [bq | bk | bv].  Returns (output, attention_weights)
    where attention_weights is None if return_attention_weights=False."""
    if query.ndim != 3 or key_value.ndim != 3:
        raise ValueError('Expected rank-3 inputs')
    B, S, Hd = query.shape
    if 0 in query.shape or 0 in key_value.shape:
        raise ValueError('Empty input tensor')
    if key_value.shape[0] != B:
        raise ValueError('Batch size mismatch between query and key_value')
    if key_value.shape[1] != S:
        raise ValueError('Sequence length mismatch between query and key_value')
    if Hd != num_heads * head_dim or key_value.shape[2] != Hd:
        raise ValueError(f'Expected input dimension {num_heads * head_dim}, got '
                         f'query: {Hd}, key/value: {key_value.shape[2]}')

    w_qkv, b_qkv = params

    # Wrapper-side pre-cast to the MXU compute dtype (halves DMA bytes / VMEM).
    query_c = query.astype(compute_dtype)
    key_value_c = key_value.astype(compute_dtype)
    w_c = w_qkv.astype(compute_dtype)
    b_c = b_qkv.astype(jnp.float32)

    vmem_limit = _vmem_limit_bytes()
    attn_bytes = jnp.dtype(attn_weights_dtype).itemsize
    TQ = _choose_tq(S, num_heads, head_dim, return_attention_weights,
                    attn_bytes, vmem_limit)
    assert S % TQ == 0
    QT = S // TQ

    kernel = _make_kernel(num_heads, head_dim, TQ, S, compute_dtype,
                          return_attention_weights)

    out_struct = jax.ShapeDtypeStruct((B, S, Hd), jnp.float32)
    out_spec = pl.BlockSpec((1, TQ, Hd), lambda b, qi: (b, qi, 0))
    if return_attention_weights:
        out_shape = (out_struct,
                     jax.ShapeDtypeStruct((B, num_heads, S, S), attn_weights_dtype))
        out_specs = [out_spec,
                     pl.BlockSpec((1, num_heads, TQ, S), lambda b, qi: (b, 0, qi, 0))]
    else:
        out_shape = out_struct
        out_specs = out_spec

    result = pl.pallas_call(
        kernel,
        out_shape=out_shape,
        grid_spec=pltpu.PrefetchScalarGridSpec(
            num_scalar_prefetch=0,
            grid=(B, QT),
            in_specs=[
                pl.BlockSpec((1, TQ, Hd), lambda b, qi: (b, qi, 0)),    # query tile (bf16)
                pl.BlockSpec((1, S, Hd), lambda b, qi: (b, 0, 0)),      # full-S key/value (bf16)
                pl.BlockSpec((Hd, 3 * Hd), lambda b, qi: (0, 0),        # fused W_qkv (resident)
                             pipeline_mode=pl.Buffered(1)),
                pl.BlockSpec((1, 3 * Hd), lambda b, qi: (0, 0),         # fused b_qkv (resident)
                             pipeline_mode=pl.Buffered(1)),
            ],
            out_specs=out_specs,
            scratch_shapes=[
                pltpu.VMEM((num_heads, S, head_dim), compute_dtype),    # cached K (head-major)
                pltpu.VMEM((num_heads, S, head_dim), compute_dtype),    # cached V (head-major)
            ],
        ),
        compiler_params=pltpu.CompilerParams(
            # qi must be "arbitrary": K/V are projected at qi==0 and reused from
            # scratch across the rest of the qi sweep for the same batch index.
            dimension_semantics=("parallel", "arbitrary"),
            vmem_limit_bytes=vmem_limit,
        ),
    )(query_c, key_value_c, w_c, b_c)

    if return_attention_weights:
        return result
    return result, None


def _init_params(key, hidden_dim):
    # Deterministic synthetic init (roughly PyTorch Linear's U(-1/sqrt(in), 1/sqrt(in))),
    # returned pre-fused: w_qkv = [Wq | Wk | Wv] (in x out), b_qkv = [bq | bk | bv].
    bound = 1.0 / (hidden_dim ** 0.5)
    keys = jax.random.split(key, 6)
    ws = [jax.random.uniform(keys[i], (hidden_dim, hidden_dim), jnp.float32, -bound, bound)
          for i in range(3)]
    bs = [jax.random.uniform(keys[3 + i], (1, hidden_dim), jnp.float32, -bound, bound)
          for i in range(3)]
    return jnp.concatenate(ws, axis=1), jnp.concatenate(bs, axis=1)


def _reference(query, key_value, w_qkv, b_qkv, num_heads, head_dim):
    B, S, Hd = query.shape
    scale = head_dim ** (-0.5)
    wq, wk, wv = w_qkv[:, :Hd], w_qkv[:, Hd:2 * Hd], w_qkv[:, 2 * Hd:]
    bq, bk, bv = b_qkv[:, :Hd], b_qkv[:, Hd:2 * Hd], b_qkv[:, 2 * Hd:]

    def proj(x, w, b):
        return (x @ w + b).reshape(B, S, num_heads, head_dim).transpose(0, 2, 1, 3)

    q = proj(query, wq, bq)
    k = proj(key_value, wk, bk)
    v = proj(key_value, wv, bv)
    scores = jnp.einsum('bhqd,bhkd->bhqk', q, k) * scale
    attn = jax.nn.softmax(scores, axis=-1)
    out = jnp.einsum('bhqk,bhkd->bhqd', attn, v)
    out = out.transpose(0, 2, 1, 3).reshape(B, S, Hd)
    return out, attn


if __name__ == "__main__":
    num_heads, head_dim = 4, 8
    hidden_dim = num_heads * head_dim
    B, S = 2, 8

    key = jax.random.PRNGKey(0)
    k1, k2, k3 = jax.random.split(key, 3)
    query = jax.random.normal(k1, (B, S, hidden_dim), jnp.float32)
    key_value = jax.random.normal(k2, (B, S, hidden_dim), jnp.float32)
    w_qkv, b_qkv = _init_params(k3, hidden_dim)

    out, attn_w = consciousness_attention(
        query, key_value, (w_qkv, b_qkv), num_heads=num_heads, head_dim=head_dim)
    jax.block_until_ready((out, attn_w))

    # Sanity check against a pure-JAX f32 reference (kernel uses bf16 MXU inputs
    # with f32 accumulation, hence the looser tolerances).
    ref_out, ref_attn = _reference(query, key_value, w_qkv, b_qkv, num_heads, head_dim)
    assert jnp.allclose(attn_w, ref_attn, atol=1e-2, rtol=1e-2), \
        float(jnp.max(jnp.abs(attn_w - ref_attn)))
    assert jnp.allclose(out, ref_out, atol=5e-2, rtol=2e-2), \
        float(jnp.max(jnp.abs(out - ref_out)))

    # Flash-style path: skip materializing the (B, H, S, S) attention weights.
    out_noattn, attn_none = consciousness_attention(
        query, key_value, (w_qkv, b_qkv), num_heads=num_heads, head_dim=head_dim,
        return_attention_weights=False)
    jax.block_until_ready(out_noattn)
    assert attn_none is None
    assert jnp.allclose(out_noattn, ref_out, atol=5e-2, rtol=2e-2), \
        float(jnp.max(jnp.abs(out_noattn - ref_out)))

    print("KERNEL_OK")
</pallas_src>

<mosaic_0001>
module attributes {stable_mosaic.version = 11 : i64} {
  func.func @kernel(%arg0: i32, %arg1: i32, %arg2: memref<1x8x32xbf16, #tpu.memory_space<vmem>>, %arg3: memref<1x8x32xbf16, #tpu.memory_space<vmem>>, %arg4: memref<32x96xbf16, #tpu.memory_space<vmem>>, %arg5: memref<1x96xf32, #tpu.memory_space<vmem>>, %arg6: memref<1x8x32xf32, #tpu.memory_space<vmem>>, %arg7: memref<1x4x8x8xf32, #tpu.memory_space<vmem>>, %arg8: memref<4x8x8xbf16, #tpu.memory_space<vmem>>, %arg9: memref<4x8x8xbf16, #tpu.memory_space<vmem>>) attributes {dimension_semantics = [#tpu.dimension_semantics<parallel>, #tpu.dimension_semantics<arbitrary>], iteration_bounds = array<i64: 2, 1>, scalar_prefetch = 0 : i64, scratch_operands = 2 : i64, tpu.core_type = #tpu.core_type<tc>, window_params = [{transform_indices = @transform_0, window_bounds = array<i64: 1, 8, 32>}, {transform_indices = @transform_1, window_bounds = array<i64: 1, 8, 32>}, {pipeline_mode = #tpu.pipeline_mode<synchronous>, transform_indices = @transform_2, window_bounds = array<i64: 32, 96>}, {pipeline_mode = #tpu.pipeline_mode<synchronous>, transform_indices = @transform_3, window_bounds = array<i64: 1, 96>}, {transform_indices = @transform_4, window_bounds = array<i64: 1, 8, 32>}, {transform_indices = @transform_5, window_bounds = array<i64: 1, 4, 8, 8>}]} {
    %c0_i32 = arith.constant 0 : i32
    %0 = arith.cmpi eq, %arg1, %c0_i32 : i32
    %1 = arith.extui %0 : i1 to i32
    %c0_i32_0 = arith.constant 0 : i32
    %2 = arith.cmpi ne, %1, %c0_i32_0 : i32
    scf.if %2 {
      %c0_25 = arith.constant 0 : index
      %c0_26 = arith.constant 0 : index
      %c0_27 = arith.constant 0 : index
      %37 = vector.load %arg3[%c0_25, %c0_26, %c0_27] : memref<1x8x32xbf16, #tpu.memory_space<vmem>>, vector<1x8x32xbf16>
      %38 = vector.shape_cast %37 : vector<1x8x32xbf16> to vector<8x32xbf16>
      %c0_28 = arith.constant 0 : index
      %c32 = arith.constant 32 : index
      %39 = vector.load %arg4[%c0_28, %c32] : memref<32x96xbf16, #tpu.memory_space<vmem>>, vector<32x64xbf16>
      %cst_29 = arith.constant dense<0.000000e+00> : vector<8x64xf32>
      %40 = tpu.matmul %38, %39, %cst_29 {dimension_numbers = #tpu.dot_dimension_numbers<[1], [0], [0], [1], [0, 0, 1, 1], [], []>} : vector<8x32xbf16>, vector<32x64xbf16>, vector<8x64xf32> -> vector<8x64xf32>
      %c0_30 = arith.constant 0 : index
      %c32_31 = arith.constant 32 : index
      %41 = vector.load %arg5[%c0_30, %c32_31] : memref<1x96xf32, #tpu.memory_space<vmem>>, vector<1x64xf32>
      %42 = vector.broadcast %41 : vector<1x64xf32> to vector<8x64xf32>
      %43 = arith.addf %40, %42 : vector<8x64xf32>
      %44 = arith.truncf %43 : vector<8x64xf32> to vector<8x64xbf16>
      %45 = vector.extract_strided_slice %44 {offsets = [0, 0], sizes = [8, 32], strides = [1, 1]} : vector<8x64xbf16> to vector<8x32xbf16>
      %46 = vector.shape_cast %45 : vector<8x32xbf16> to vector<8x4x8xbf16>
      %47 = tpu.transpose %46, [1, 0, 2] : vector<8x4x8xbf16> -> vector<4x8x8xbf16>
      %c0_32 = arith.constant 0 : index
      %c0_33 = arith.constant 0 : index
      %c0_34 = arith.constant 0 : index
      %48 = vector.load %arg8[%c0_32, %c0_33, %c0_34] : memref<4x8x8xbf16, #tpu.memory_space<vmem>>, vector<4x8x8xbf16>
      tpu.vector_store %arg8[%c0_32, %c0_33, %c0_34], %47 {strides = array<i32>} : memref<4x8x8xbf16, #tpu.memory_space<vmem>>, vector<4x8x8xbf16>,
      %49 = vector.extract_strided_slice %44 {offsets = [0, 32], sizes = [8, 32], strides = [1, 1]} : vector<8x64xbf16> to vector<8x32xbf16>
      %50 = vector.shape_cast %49 : vector<8x32xbf16> to vector<8x4x8xbf16>
      %51 = tpu.transpose %50, [1, 0, 2] : vector<8x4x8xbf16> -> vector<4x8x8xbf16>
      %c0_35 = arith.constant 0 : index
      %c0_36 = arith.constant 0 : index
      %c0_37 = arith.constant 0 : index
      %52 = vector.load %arg9[%c0_35, %c0_36, %c0_37] : memref<4x8x8xbf16, #tpu.memory_space<vmem>>, vector<4x8x8xbf16>
      tpu.vector_store %arg9[%c0_35, %c0_36, %c0_37], %51 {strides = array<i32>} : memref<4x8x8xbf16, #tpu.memory_space<vmem>>, vector<4x8x8xbf16>,
    } else {
    }
    %c0 = arith.constant 0 : index
    %c0_1 = arith.constant 0 : index
    %c0_2 = arith.constant 0 : index
    %3 = vector.load %arg2[%c0, %c0_1, %c0_2] : memref<1x8x32xbf16, #tpu.memory_space<vmem>>, vector<1x8x32xbf16>
    %4 = vector.shape_cast %3 : vector<1x8x32xbf16> to vector<8x32xbf16>
    %c0_3 = arith.constant 0 : index
    %c0_4 = arith.constant 0 : index
    %5 = vector.load %arg4[%c0_3, %c0_4] : memref<32x96xbf16, #tpu.memory_space<vmem>>, vector<32x32xbf16>
    %cst = arith.constant dense<0.000000e+00> : vector<8x32xf32>
    %6 = tpu.matmul %4, %5, %cst {dimension_numbers = #tpu.dot_dimension_numbers<[1], [0], [0], [1], [0, 0, 1, 1], [], []>} : vector<8x32xbf16>, vector<32x32xbf16>, vector<8x32xf32> -> vector<8x32xf32>
    %c0_5 = arith.constant 0 : index
    %c0_6 = arith.constant 0 : index
    %7 = vector.load %arg5[%c0_5, %c0_6] : memref<1x96xf32, #tpu.memory_space<vmem>>, vector<1x32xf32>
    %8 = vector.broadcast %7 : vector<1x32xf32> to vector<8x32xf32>
    %9 = arith.addf %6, %8 : vector<8x32xf32>
    %cst_7 = arith.constant 0.353553385 : f32
    %10 = vector.broadcast %cst_7 : f32 to vector<8x32xf32>
    %11 = arith.mulf %9, %10 : vector<8x32xf32>
    %12 = arith.truncf %11 : vector<8x32xf32> to vector<8x32xbf16>
    %13 = vector.shape_cast %12 : vector<8x32xbf16> to vector<8x4x8xbf16>
    %14 = tpu.transpose %13, [1, 0, 2] : vector<8x4x8xbf16> -> vector<4x8x8xbf16>
    %c0_8 = arith.constant 0 : index
    %c0_9 = arith.constant 0 : index
    %c0_10 = arith.constant 0 : index
    %15 = vector.load %arg8[%c0_8, %c0_9, %c0_10] : memref<4x8x8xbf16, #tpu.memory_space<vmem>>, vector<4x8x8xbf16>
    "tpu.trace_start"() <{level = 10 : i32, message = "hqd,hkd->hqk"}> : () -> ()
    %cst_11 = arith.constant dense<0.000000e+00> : vector<4x8x8xf32>
    %16 = tpu.matmul %14, %15, %cst_11 {dimension_numbers = #tpu.dot_dimension_numbers<[2], [2], [1], [1], [0, 0, 0, 1, 1, 1], [0], [0]>} : vector<4x8x8xbf16>, vector<4x8x8xbf16>, vector<4x8x8xf32> -> vector<4x8x8xf32>
    "tpu.trace_stop"() : () -> ()
    %cst_12 = arith.constant dense<0xFF800000> : vector<4x8xf32>
    %17 = vector.multi_reduction <maximumf>, %16, %cst_12 [2] : vector<4x8x8xf32> to vector<4x8xf32>
    %18 = vector.shape_cast %17 : vector<4x8xf32> to vector<4x8x1xf32>
    %19 = vector.broadcast %18 : vector<4x8x1xf32> to vector<4x8x8xf32>
    %20 = arith.subf %16, %19 : vector<4x8x8xf32>
    %21 = math.exp %20 : vector<4x8x8xf32>
    %cst_13 = arith.constant dense<0.000000e+00> : vector<4x8xf32>
    %22 = vector.multi_reduction <add>, %21, %cst_13 [2] : vector<4x8x8xf32> to vector<4x8xf32>
    %23 = vector.shape_cast %22 : vector<4x8xf32> to vector<4x8x1xf32>
    %24 = vector.broadcast %23 : vector<4x8x1xf32> to vector<4x8x8xf32>
    %25 = arith.divf %21, %24 : vector<4x8x8xf32>
    %c0_14 = arith.constant 0 : index
    %c0_15 = arith.constant 0 : index
    %c0_16 = arith.constant 0 : index
    %c0_17 = arith.constant 0 : index
    %26 = vector.load %arg7[%c0_14, %c0_15, %c0_16, %c0_17] : memref<1x4x8x8xf32, #tpu.memory_space<vmem>>, vector<1x4x8x8xf32>
    %27 = vector.shape_cast %26 : vector<1x4x8x8xf32> to vector<4x8x8xf32>
    %28 = vector.shape_cast %25 : vector<4x8x8xf32> to vector<1x4x8x8xf32>
    tpu.vector_store %arg7[%c0_14, %c0_15, %c0_16, %c0_17], %28 {strides = array<i32>} : memref<1x4x8x8xf32, #tpu.memory_space<vmem>>, vector<1x4x8x8xf32>,
    %29 = arith.truncf %25 : vector<4x8x8xf32> to vector<4x8x8xbf16>
    %c0_18 = arith.constant 0 : index
    %c0_19 = arith.constant 0 : index
    %c0_20 = arith.constant 0 : index
    %30 = vector.load %arg9[%c0_18, %c0_19, %c0_20] : memref<4x8x8xbf16, #tpu.memory_space<vmem>>, vector<4x8x8xbf16>
    "tpu.trace_start"() <{level = 10 : i32, message = "hqk,hkd->hqd"}> : () -> ()
    %cst_21 = arith.constant dense<0.000000e+00> : vector<4x8x8xf32>
    %31 = tpu.matmul %29, %30, %cst_21 {dimension_numbers = #tpu.dot_dimension_numbers<[2], [1], [1], [2], [0, 0, 0, 1, 1, 2], [0], [0]>} : vector<4x8x8xbf16>, vector<4x8x8xbf16>, vector<4x8x8xf32> -> vector<4x8x8xf32>
    "tpu.trace_stop"() : () -> ()
    %32 = tpu.transpose %31, [1, 0, 2] : vector<4x8x8xf32> -> vector<8x4x8xf32>
    %33 = vector.shape_cast %32 : vector<8x4x8xf32> to vector<8x32xf32>
    %c0_22 = arith.constant 0 : index
    %c0_23 = arith.constant 0 : index
    %c0_24 = arith.constant 0 : index
    %34 = vector.load %arg6[%c0_22, %c0_23, %c0_24] : memref<1x8x32xf32, #tpu.memory_space<vmem>>, vector<1x8x32xf32>
    %35 = vector.shape_cast %34 : vector<1x8x32xf32> to vector<8x32xf32>
    %36 = vector.shape_cast %33 : vector<8x32xf32> to vector<1x8x32xf32>
    tpu.vector_store %arg6[%c0_22, %c0_23, %c0_24], %36 {strides = array<i32>} : memref<1x8x32xf32, #tpu.memory_space<vmem>>, vector<1x8x32xf32>,
    return
  }
  func.func @transform_0(%arg0: i32, %arg1: i32) -> (i32, i32, i32) {
    %c0_i32 = arith.constant 0 : i32
    %c0_i32_0 = arith.constant 0 : i32
    return %arg0, %arg1, %c0_i32 : i32, i32, i32
  }
  func.func @transform_1(%arg0: i32, %arg1: i32) -> (i32, i32, i32) {
    %c0_i32 = arith.constant 0 : i32
    %c0_i32_0 = arith.constant 0 : i32
    %c0_i32_1 = arith.constant 0 : i32
    return %arg0, %c0_i32, %c0_i32_0 : i32, i32, i32
  }
  func.func @transform_2(%arg0: i32, %arg1: i32) -> (i32, i32) {
    %c0_i32 = arith.constant 0 : i32
    %c0_i32_0 = arith.constant 0 : i32
    %c0_i32_1 = arith.constant 0 : i32
    return %c0_i32, %c0_i32_0 : i32, i32
  }
  func.func @transform_3(%arg0: i32, %arg1: i32) -> (i32, i32) {
    %c0_i32 = arith.constant 0 : i32
    %c0_i32_0 = arith.constant 0 : i32
    %c0_i32_1 = arith.constant 0 : i32
    return %c0_i32, %c0_i32_0 : i32, i32
  }
  func.func @transform_4(%arg0: i32, %arg1: i32) -> (i32, i32, i32) {
    %c0_i32 = arith.constant 0 : i32
    %c0_i32_0 = arith.constant 0 : i32
    return %arg0, %arg1, %c0_i32 : i32, i32, i32
  }
  func.func @transform_5(%arg0: i32, %arg1: i32) -> (i32, i32, i32, i32) {
    %c0_i32 = arith.constant 0 : i32
    %c0_i32_0 = arith.constant 0 : i32
    %c0_i32_1 = arith.constant 0 : i32
    return %arg0, %c0_i32, %arg1, %c0_i32_0 : i32, i32, i32, i32
  }
}

</mosaic_0001>

<bundles_post_ra>
// kernel: tpu_custom_call.1
= control target key start
LH: loop header
LB: loop body
LE: loop exit
PB: predicated region body
PF: predicated region fallthrough
CT: control target
= control target key end

     0   :  { %s2205_s0 = inlined_call_operand.hbm [shape: bf16[2,8,32], index: 0, kind: input, shape index: {}]   ;;  %s2206_s1 = inlined_call_operand.hbm [shape: bf16[2,8,32], index: 1, kind: input, shape index: {}]   ;;  %s2207_s2 = inlined_call_operand.hbm [shape: bf16[32,96], index: 2, kind: input, shape index: {}]   ;;  %s2208_s3 = inlined_call_operand.vmem [shape: f32[1,96], index: 3, kind: input, shape index: {}]   ;;  %s2209_s4 = inlined_call_operand.hbm [shape: f32[2,8,32], index: 4, kind: output, shape index: {0}]   ;;  %s2210_s5 = inlined_call_operand.hbm [shape: f32[2,4,8,8], index: 5, kind: output, shape index: {1}]  }
   0x1   :  { %2215 = sst [smem:[#allocation23_spill]] %s2207_s2 }
   0x2   :  { %11 = vsyncpa [#allocation5], 0 }
   0x3   :  { %13 = vsyncpa [#allocation5 + $0x1], 0 }
   0x4   :  { %14 = vsyncpa [#allocation8], 0 }
   0x5   :  { %16 = vsyncpa [#allocation8 + $0x1], 0 }
   0x6   :  { %17 = vsyncpa [#allocation6], 0 }
   0x7   :  { %19 = vsyncpa [#allocation6 + $0x1], 0 }
   0x8   :  { %20 = vsyncpa [#allocation12], 0 }
   0x9   :  { %22 = vsyncpa [#allocation12 + $0x1], 0  ;;  %s1805_s18 = smov 0   ;;  %s1807_s19 = smov 0  }
   0xa   :  { %s1809_s20 = smov 0   ;;  %s1811_s21 = smov 0  }
   0xb   :  { %s1813_s22 = smov 0   ;;  %s1815_s23 = smov 0  }
   0xc LB: > { %2216 = sst [smem:[#allocation18_spill]] %s1748_s20  ;;  %s1836_s24 = sadd.s32 4294967295, %s1760_s23   ;;  %s1760_s23 = sphi %s1815_s23, %s28_s23   ;;  %s1756_s22 = sphi %s1813_s22, %s2231_s22   ;;  %s1752_s21 = sphi %s1811_s21, %s2230_s21   ;;  %s1748_s20 = sphi %s1809_s20, %s2229_s20   ;;  %s1744_s19 = sphi %s1807_s19, %s2233_s19   ;;  %s1740_s18 = sphi %s1805_s18, %s2232_s18  }
   0xd   : > { %2217 = sst [smem:[#allocation19_spill]] %s1756_s22  ;;  %p1384_p0 = scmp.ge.s32.totalorder %s1760_s23, 1 }
   0xe   : > { %p63_p1 = scmp.eq.s32.totalorder %s1836_s24, 0  ;;  %p197_p2 = scmp.lt.s32.totalorder %s1760_s23, 3 }
   0xf   : > { %s2218_s2 = sld [smem:[#allocation23_spill]]  ;;  %s1762_s29 = smov [#allocation9]  }
  0x10   : > { %p1844_p3 = pnand %p1384_p0, %p197_p2  ;;  %s210_s30 = sshll.u32 %s1762_s29, 4  ;;  %s211_s30 = int_to_ptr.vmem [resolvable:$true] %s210_s30 }
  0x11   : > { %p1386_p6 = scmp.ge.s32.totalorder %s1760_s23, 2  ;;  %s1763_s6 = smov 64  }
  0x12   : > { %p1447_p4 = pneg %p1844_p3  ;;  %s1764_s7 = smov 4  }
  0x13   : > { %s1383_s8 = sadd.s32 4294967294, %s1760_s23   ;;  %s40_s9 = sadd.s32 1, %s1756_s22 }
  0x14   : > { %p1448_p5 = pnand %p1447_p4, %p63_p1  ;;  %s49_s10 = sadd.s32 1, %s1748_s20 }
  0x15   : > { %s208_s27 = sshll.u32 %s2218_s2, 4  ;;  %p42_p7 = scmp.ge.s32.totalorder %s40_s9, 2  ;;  %s209_s27 = int_to_ptr.hbm [resolvable:$true] %s208_s27 }
  0x16   : > { %1450 = dma.hbm_to_vmem [thread:$0]  (!%p1448_p5), %s209_s27, 256, %s211_s30, [#allocation8], %s1763_s6, %s1763_s6, %s1764_s7  }
  0x17   : > { %p56_p8 = scmp.ne.s32.totalorder %s1748_s20, %s1744_s19  ;;  %p57_p9 = scmp.eq.s32.totalorder %s1760_s23, 0 }
  0x18   : > { %p62_p10 = scmp.ne.s32.totalorder %s1744_s19, %s1740_s18  ;;  %s2235_s9 = smov (%p42_p7, %s40_s9), 0 }
  0x19   : > { %2220 = sst [smem:[#allocation20_spill]] %s2235_s9  ;;  %p1863_p11 = por %p57_p9, %p56_p8 }
  0x1a   : > { %p1869_p12 = por %p63_p1, %p62_p10  ;;  %s44_s13 = ssub.s32 %s1756_s22, %s2235_s9 }
  0x1b   : > { %p156_p13 = scmp.eq.s32.totalorder %s1836_s24, 1  ;;  %p47_p0 = scmp.eq.s32.totalorder %s44_s13, 0 }
  0x1c   : > { %p162_p2 = scmp.eq.s32.totalorder %s1383_s8, 1  ;;  %p1466_p5 = scmp.lt.s32.totalorder %s1760_s23, 2 }
  0x1d   : > { %p1876_p4 = por %p156_p13, %p56_p8  ;;  %s227_s17 = sand.u32 1, %s1748_s20  }
  0x1e   : > { %s1882_s15 = scalar_select %p47_p0, %s1748_s20, %s49_s10  }
  0x1f   : > { %p1884_p7 = por %p162_p2, %p62_p10  ;;  %s1387_s25 = sshll.u32 %s227_s17, 2 }
  0x20   : > { %2224 = sst [smem:[#allocation21_spill]] %s1882_s15  ;;  %s1388_s26 = sshll.u32 %s1756_s22, 2 }
  0x21   : > { %s2225_s16 = scalar_select %p1884_p7, 1, 0 }
  0x22   : > { %s236_s30 = scalar_lea.hbm %s2205_s0, %s1388_s26  ;;  %s231_s6 = scalar_lea.vmem [#allocation4], %s1387_s25 }
  0x23   : > { %2226 = sst [smem:[#allocation22_spill]] %s2225_s16  ;;  %s240_s7 = sshll.u32 %s231_s6, 4  ;;  %s241_s7 = int_to_ptr.vmem [resolvable:$true] %s240_s7 }
  0x24   : > { %s238_s8 = sshll.u32 %s236_s30, 4  ;;  %p1452_p8 = pnand %p1466_p5, %p1863_p11  ;;  %s239_s8 = int_to_ptr.hbm [resolvable:$true] %s238_s8 }
  0x25   : > { %s255_s2 = scalar_lea.hbm %s2206_s1, %s1388_s26  ;;  %s247_s9 = sand.u32 1, %s1760_s23  }
  0x26   : > { %s228_s15 = scalar_lea.sflag [#allocation5], %s227_s17  ;;  %s257_s20 = sshll.u32 %s255_s2, 4  ;;  %s258_s20 = int_to_ptr.hbm [resolvable:$true] %s257_s20 }
  0x27   : > { %1454 = dma.hbm_to_vmem [thread:$0]  (!%p1452_p8), %s239_s8, 64, %s241_s7, %s228_s15  }
  0x28   : > { %s251_s22 = scalar_lea.vmem [#allocation7], %s1387_s25  ;;  %s248_s27 = scalar_lea.sflag [#allocation8], %s247_s9 }
  0x29   : > { %s259_s16 = sshll.u32 %s251_s22, 4  ;;  %268 = sbr.rel (%p1844_p3) target bundleno = 1147 (0x47b), region = 36  ;;  %s260_s16 = int_to_ptr.vmem [resolvable:$true] %s259_s16 }
  0x2a   : > { %1457 = dma.hbm_to_vmem [thread:$0]  (!%p1452_p8), %s258_s20, 64, %s260_s16, %s248_s27  }
  0x2b   : > { %s1902_s11 = sand.u32 (!%p1844_p3), 1, %s1744_s19  }
  0x2c   : > { %s1392_s26 = sshll.u32 (!%p1844_p3), %s1902_s11, 2  ;;  %s271_s29 = scalar_lea.sflag (!%p1844_p3), [#allocation5], %s1902_s11 }
  0x2d   : > { %s274_s17 = scalar_lea.vmem (!%p1844_p3), [#allocation4], %s1392_s26 }
  0x2e   : > { %1719 = dma.done.wait (%p1869_p12), %s271_s29, 64  }
  0x2f   : > { %1721 = vsyncadd (%p1869_p12), %s271_s29, 4294967232  ;;  %s280_s2 = sand.u32 1, %s1836_s24   ;;  %s284_s22 = scalar_lea.vmem [#allocation7], %s1392_s26 }
  0x30   : > { %s281_s20 = scalar_lea.sflag [#allocation8], %s280_s2 }
  0x31   : > { %1723 = dma.done.wait (%p1869_p12), %s281_s20, 64  }
  0x32   : > { %1725 = vsyncadd (%p1869_p12), %s281_s20, 4294967232 }
  0x33   : > { %1727 = dma.done.wait (%p63_p1), [#allocation8], 256  }
  0x34   : > { %1729 = vsyncadd (%p63_p1), [#allocation8], 4294967040  ;;  %v1431_v0 = vld [vmem:[#allocation9 + $0x8] sm:$0xff]  ;;  %s1765_s28 = smov 96   ;;  %v1432_v2 = vld [vmem:[#allocation9] sm:$0xff]  ;;  %vm359_vm0 = vcmask 261120  }
  0x35   : > { %v1433_v1 = vld [vmem:[#allocation9 + $0x8] sm:$0xff]  ;;  %352 = vrot.lane.b32.xlu0 %v1431_v0, %s1765_s28  ;;  %v1430_v3 = vld [vmem:[#allocation9] sm:$0xff]  ;;  %v638_v4 = vld [vmem:[%s274_s17] sm:$0xf]  ;;  %s1766_s16 = smov 120   ;;  %s1767_s25 = smov 112  }
  0x36   : > { %669 = vmatpush.bf16.msra.mxu1 %v1433_v1  ;;  %v1530_v5 = vld [vmem:[%s2208_s3] ss:$0 sm:$0xff]  ;;  %v332_v8 = vld [vmem:[%s284_s22] sm:$0xf]  ;;  %s1768_s30 = smov 104   ;;  %vm407_vm1 = vcmask 1047556  }
  0x37   : > { %356 = vrot.lane.b32.xlu1 %v1530_v5, %s1765_s28  ;;  %v1531_v9 = vld [vmem:[%s2208_s3] ss:$0 sm:$0xff]  ;;  %v1769_v22 = vmov 1983009808   ;;  %v1770_v30 = vmov 1934713408  }
  0x38   : > { %v398_v23 = vunpack.c.l.s4 %v1769_v22  ;;  %v412_v31 = vunpack.c.l.s4 %v1770_v30  ;;  %vm503_vm2 = vcmask 60416   ;;  %vm804_vm3 = vcmask 64512   ;;  %s1396_s6 = sshll.u32 %s1902_s11, 5  ;;  %s1434_s8 = sshll.u32 %s1752_s21, 5 }
  0x39   : > { %vm992_vm4 = vcmask 1043456   ;;  %s2085_s7 = scalar_lea.vmem [#allocation11], %s1396_s6  ;;  %s1228_s27 = scalar_lea.hbm %s2210_s5, %s1434_s8 }
  0x3a   : > { %670 = vmatpush.bf16.msra.mxu1 %v1432_v2  ;;  %v1939_v27 = vunpack.c.0.s8 %v398_v23  ;;  %v1947_v40 = vunpack.c.0.s8 %v412_v31  ;;  %s1229_s26 = sshll.u32 %s2085_s7, 4  ;;  %s1231_s29 = sshll.u32 %s1228_s27, 4  ;;  %s2146_s26 = int_to_ptr.vmem [resolvable:$true] %s1229_s26  ;;  %s1232_s29 = int_to_ptr.hbm [resolvable:$true] %s1231_s29 }
  0x3b   : > { %s1771_s17 = smov 24   ;;  %s1772_s2 = smov 16  }
  0x3c   : > { %s1201_s20 = scalar_lea.sflag [#allocation12], %s1902_s11  ;;  %s1652_s22 = sshra.s32 %s1232_s29, 4  ;;  %s1653_s22 = int_to_ptr.hbm [resolvable:$true] %s1652_s22 }
  0x3d   : > { %1414 = vmatmul.msk.bf16.vlgmr.msra.gmra.mxu1 %vm359_vm0, %v638_v4  ;;  %350 = vrot.lane.b32.xlu0 %v1430_v3, %s1765_s28  ;;  %s1658_s24 = scalar_lea.hbm %s2210_s5, 64  ;;  %p1659_p10 = scmp.lt.s32.totalorder %s1653_s22, %s2210_s5 }
  0xa7   : > { %v353_v6 = vpop.permute.xlu0 %352 }
  0xa8   : > { %369 = vmatpush.bf16.msra.mxu0 %v353_v6 }
  0xa9   : > { %v357_v15 = vpop.permute.xlu1 %356 }
  0xaf   : > { %v351_v7 = vpop.permute.xlu0 %350 }
  0xb0   : > { %370 = vmatpush.bf16.msra.mxu0 %v351_v7 }
  0xb3   : > { %1405 = vmatmul.msk.bf16.vlgmr.msra.gmra.mxu0 %vm359_vm0, %v332_v8 }
  0xba   : > { %v672_v10 = vpop.f32.mrf.mxu1 }
  0xbb   : > { %v673_v11 = vadd.f32 %v1531_v9, %v672_v10 }
  0xbd   : > { %v676_v12 = vmul.f32 0.35355338, %v673_v11 }
  0xbf   : > { %v677_v13 = vpack.c.bf16 %v676_v12, %v676_v12 }
  0xc1   : > { %679 = vrot.lane.b32.xlu0 %v677_v13, %s1766_s16  ;;  %v688_v33 = vshrl.u32 %v677_v13, 16 }
  0xc2   : > { %v674_v14 = vpop.f32.mrf.mxu1 }
 0x130   : > { %v372_v16 = vpop.f32.mrf.mxu0 }
 0x131   : > { %v373_v17 = vadd.f32 %v372_v16, %v357_v15 }
 0x133   : > { %v376_v18 = vpack.c.bf16 %v373_v17, %v373_v17  ;;  %v680_v28 = vpop.permute.xlu0 %679 }
 0x134   : > { %v689_v34 = vshrl.u32 %v680_v28, 16  ;;  %v687_v41 = vpack.i.b16 %v680_v28, %v677_v13 }
 0x135   : > { %508 = vrot.lane.b32.xlu0 %v376_v18, %s1765_s28  ;;  %380 = vrot.lane.b32.xlu2 %v376_v18, %s1767_s25  ;;  %v387_v38 = vshrl.u32 %v376_v18, 16 }
 0x136   : > { %378 = vrot.lane.b32.xlu1 %v376_v18, %s1766_s16  ;;  %v690_v45 = vpack.i.b16 %v689_v34, %v688_v33  ;;  %v701_v52 = vperm.slane %v687_v41, %v1939_v27 }
 0x138   : > { %v374_v19 = vpop.f32.mrf.mxu0  ;;  %v728_v56 = vperm.slane %v690_v45, %v1939_v27  ;;  %v710_v4 = vrot.slane %v701_v52, 4 }
 0x13a   : > { %v736_v7 = vrot.slane %v728_v56, 4 }
 0x13d   : > { %382 = vrot.lane.b32.xlu2 %v376_v18, %s1768_s30 }
 0x13e   : > { %681 = vrot.lane.b32.xlu1 %v677_v13, %s1767_s25 }
 0x145   : > { %683 = vrot.lane.b32.xlu2 %v677_v13, %s1768_s30 }
 0x18f   : > { %v1931_v20 = vpop.permute.xlu2 %380 }
 0x190   : > { %v393_v25 = vshrl.u32 %v1931_v20, 16 }
 0x197   : > { %v1933_v21 = vpop.permute.xlu2 %382 }
 0x198   : > { %v394_v24 = vshrl.u32 %v1933_v21, 16  ;;  %v392_v26 = vpack.i.b16 %v1933_v21, %v1931_v20 }
 0x19a   : > { %v395_v29 = vpack.i.b16 %v394_v24, %v393_v25  ;;  %v405_v32 = vperm.slane %v392_v26, %v1939_v27 }
 0x19c   : > { %v432_v36 = vperm.slane %v395_v29, %v1939_v27  ;;  %v406_v42 = vrot.slane %v405_v32, 4 }
 0x19e   : > { %v433_v46 = vrot.slane %v432_v36, 4 }
 0x19f   : > { %v684_v50 = vpop.permute.xlu2 %683 }
 0x1a0   : > { %v695_v61 = vshrl.u32 %v684_v50, 16 }
 0x1a8   : > { %v1942_v35 = vpop.permute.xlu1 %378 }
 0x1a9   : > { %v386_v37 = vpack.i.b16 %v1942_v35, %v376_v18  ;;  %v388_v39 = vshrl.u32 %v1942_v35, 16 }
 0x1ab   : > { %v389_v43 = vpack.i.b16 %v388_v39, %v387_v38  ;;  %v400_v44 = vperm.slane %v386_v37, %v1939_v27 }
 0x1ad   : > { %v408_v47 = vsel %vm407_vm1, %v406_v42, %v400_v44  ;;  %v409_v48 = vrot.slane %v400_v44, 4  ;;  %v427_v49 = vperm.slane %v389_v43, %v1939_v27 }
 0x1ae   : > { %v414_v51 = vperm.slane %v408_v47, %v1947_v40 }
 0x1af   : > { %v410_v53 = vsel %vm407_vm1, %v405_v32, %v409_v48  ;;  %v434_v54 = vsel %vm407_vm1, %v433_v46, %v427_v49  ;;  %v435_v55 = vrot.slane %v427_v49, 4 }
 0x1b0   : > { %v418_v57 = vperm.slane %v410_v53, %v1947_v40  ;;  %v419_v58 = vrot.slane %v414_v51, 4  ;;  %v440_v59 = vperm.slane %v434_v54, %v1947_v40  ;;  %v682_v60 = vpop.permute.xlu1 %681 }
 0x1b1   : > { %v436_v62 = vsel %vm407_vm1, %v432_v36, %v435_v55  ;;  %v693_v63 = vpack.i.b16 %v684_v50, %v682_v60  ;;  %v694_v0 = vshrl.u32 %v682_v60, 16 }
 0x1b2   : > { %v421_v1 = vrot.slane %v418_v57, 4  ;;  %v444_v2 = vperm.slane %v436_v62, %v1947_v40  ;;  %v445_v3 = vrot.slane %v440_v59, 4  ;;  %v420_v8 = vsel %vm407_vm1, 0, %v419_v58 }
 0x1b3   : > { %v696_v5 = vpack.i.b16 %v695_v61, %v694_v0  ;;  %v706_v6 = vperm.slane %v693_v63, %v1939_v27 }
 0x1b4   : > { %v422_v9 = vsel %vm407_vm1, 0, %v421_v1  ;;  %v447_v10 = vrot.slane %v444_v2, 4  ;;  %v446_v11 = vsel %vm407_vm1, 0, %v445_v3  ;;  %v449_v16 = vsel %vm407_vm1, %v421_v1, %v414_v51 }
 0x1b5   : > { %v454_v12 = vrot.slane %v422_v9, 4  ;;  %v707_v13 = vrot.slane %v706_v6, 4  ;;  %v711_v14 = vsel %vm407_vm1, %v706_v6, %v710_v4  ;;  %v733_v18 = vperm.slane %v696_v5, %v1939_v27 }
 0x1b6   : > { %v448_v15 = vsel %vm407_vm1, 0, %v447_v10  ;;  %v719_v17 = vperm.slane %v711_v14, %v1947_v40  ;;  %v468_v22 = vsel %vm407_vm1, %v447_v10, %v440_v59  ;;  %v453_v30 = vperm.slane %v449_v16, %v1939_v27 }
 0x1b7   : > { %v455_v19 = vsel %vm407_vm1, %v454_v12, %v420_v8  ;;  %v473_v23 = vrot.slane %v448_v15, 4  ;;  %v709_v24 = vsel %vm407_vm1, %v707_v13, %v701_v52  ;;  %v734_v29 = vrot.slane %v733_v18, 4 }
 0x1b8   : > { %v459_v25 = vperm.slane %v455_v19, %v1939_v27  ;;  %v715_v26 = vperm.slane %v709_v24, %v1947_v40  ;;  %v722_v28 = vrot.slane %v719_v17, 4  ;;  %v737_v32 = vsel %vm407_vm1, %v733_v18, %v736_v7 }
 0x1b9   : > { %v474_v31 = vsel %vm407_vm1, %v473_v23, %v446_v11  ;;  %v472_v38 = vperm.slane %v468_v22, %v1939_v27  ;;  %v735_v39 = vsel %vm407_vm1, %v734_v29, %v728_v56  ;;  %v745_v41 = vperm.slane %v737_v32, %v1947_v40 }
 0x1ba   : > { %v460_v33 = vrot.slane %v459_v25, 4  ;;  %v478_v34 = vperm.slane %v474_v31, %v1939_v27  ;;  %v720_v36 = vrot.slane %v715_v26, 4  ;;  %v723_v37 = vsel %vm407_vm1, 0, %v722_v28 }
 0x1bb   : > { %v755_v42 = vrot.slane %v723_v37, 4  ;;  %v741_v46 = vperm.slane %v735_v39, %v1947_v40  ;;  %v748_v48 = vrot.slane %v745_v41, 4  ;;  %v750_v58 = vsel %vm407_vm1, %v722_v28, %v715_v26 }
 0x1bc   : > { %v461_v43 = vsel %vm407_vm1, %v460_v33, %v453_v30  ;;  %v479_v44 = vrot.slane %v478_v34, 4  ;;  %v721_v45 = vsel %vm407_vm1, 0, %v720_v36  ;;  %v754_v9 = vperm.slane %v750_v58, %v1939_v27 }
 0x1bd   : > { %v465_v47 = vperm.slane %v461_v43, %v1947_v40  ;;  %v756_v49 = vsel %vm407_vm1, %v755_v42, %v721_v45  ;;  %v746_v51 = vrot.slane %v741_v46, 4  ;;  %v749_v55 = vsel %vm407_vm1, 0, %v748_v48 }
 0x1be   : > { %v480_v50 = vsel %vm407_vm1, %v479_v44, %v472_v38  ;;  %v760_v52 = vperm.slane %v756_v49, %v1939_v27  ;;  %v774_v59 = vrot.slane %v749_v55, 4  ;;  %v769_v1 = vsel %vm407_vm1, %v748_v48, %v741_v46 }
 0x1bf   : > { %v466_v53 = vrot.slane %v465_v47, 4  ;;  %v484_v54 = vperm.slane %v480_v50, %v1947_v40  ;;  %v491_v56 = vshrl.u32 %v465_v47, 16  ;;  %v747_v57 = vsel %vm407_vm1, 0, %v746_v51 }
 0x1c0   : > { %v761_v0 = vrot.slane %v760_v52, 4  ;;  %v775_v2 = vsel %vm407_vm1, %v774_v59, %v747_v57  ;;  %v773_v10 = vperm.slane %v769_v1, %v1939_v27 }
 0x1c1   : > { %v467_v60 = vsel %vm407_vm1, 0, %v466_v53  ;;  %v485_v61 = vrot.slane %v484_v54, 4  ;;  %v489_v62 = vpack.i.b16 %v484_v54, %v465_v47  ;;  %v492_v63 = vshrl.u32 %v484_v54, 16  ;;  %v509_v54 = vpop.permute.xlu0 %508 }
 0x1c2   : > { %v779_v5 = vperm.slane %v775_v2, %v1939_v27  ;;  %v499_v7 = vshrl.u32 %v467_v60, 16  ;;  %v762_v13 = vsel %vm407_vm1, %v761_v0, %v754_v9 }
 0x1c3   : > { %v486_v3 = vsel %vm407_vm1, 0, %v485_v61  ;;  %v493_v4 = vpack.i.b16 %v492_v63, %v491_v56  ;;  %504 = vst.msk [vmem:[#allocation2] sm:$0xf] %vm503_vm2, %v489_v62  ;;  %v766_v16 = vperm.slane %v762_v13, %v1947_v40 }
 0x1c4   : > { %v497_v6 = vpack.i.b16 %v486_v3, %v467_v60  ;;  %v500_v8 = vshrl.u32 %v486_v3, 16  ;;  %v780_v11 = vrot.slane %v779_v5, 4 }
 0x1c5   : > { %505 = vst.msk [vmem:[#allocation2 + $0x4] sm:$0xf] %vm503_vm2, %v493_v4  ;;  %v767_v25 = vrot.slane %v766_v16, 4  ;;  %v791_v33 = vshrl.u32 %v766_v16, 16 }
 0x1c6   : > { %v501_v12 = vpack.i.b16 %v500_v8, %v499_v7  ;;  %506 = vst.msk [vmem:[#allocation2 + $0x8] sm:$0xf] %vm503_vm2, %v497_v6  ;;  %v781_v14 = vsel %vm407_vm1, %v780_v11, %v773_v10 }
 0x1c7   : > { %v785_v15 = vperm.slane %v781_v14, %v1947_v40  ;;  %v768_v34 = vsel %vm407_vm1, 0, %v767_v25 }
 0x1c8   : > { %507 = vst.msk [vmem:[#allocation2 + $0xc] sm:$0xf] %vm503_vm2, %v501_v12  ;;  %v797_v39 = vshrl.u32 %v768_v34, 16 }
 0x1c9   : > { %v786_v19 = vrot.slane %v785_v15, 4  ;;  %v792_v29 = vshrl.u32 %v785_v15, 16  ;;  %v790_v32 = vpack.i.b16 %v785_v15, %v766_v16  ;;  %v519_v16 = vshrl.u32 %v509_v54, 16 }
 0x1ca   : > { %v800_v17 = vld [vmem:[#allocation2] sm:$0xf] }
 0x1cb   : > { %v809_v18 = vsel %vm804_vm3, %v800_v17, 0  ;;  %v787_v30 = vsel %vm407_vm1, 0, %v786_v19  ;;  %v793_v37 = vpack.i.b16 %v792_v29, %v791_v33 }
 0x1cc   : > { %818 = vmatpush.bf16.xpose.msra.mxu2 %v809_v18  ;;  %v801_v22 = vld [vmem:[#allocation2 + $0x4] sm:$0xf]  ;;  %v798_v36 = vshrl.u32 %v787_v30, 16  ;;  %v796_v38 = vpack.i.b16 %v787_v30, %v768_v34 }
 0x1cd   : > { %v828_v23 = vsel %vm804_vm3, %v801_v22, 0  ;;  %v802_v24 = vld [vmem:[#allocation2 + $0x8] sm:$0xf] }
 0x1ce   : > { %837 = vmatpush.bf16.xpose.msra.mxu3 %v828_v23  ;;  %v847_v26 = vsel %vm804_vm3, %v802_v24, 0  ;;  %v799_v41 = vpack.i.b16 %v798_v36, %v797_v39 }
 0x1cf   : > { %856 = vmatpush.bf16.xpose.msrb.mxu0 %v847_v26  ;;  %v803_v28 = vld [vmem:[#allocation2 + $0xc] sm:$0xf] }
 0x1d0   : > { %v866_v31 = vsel %vm804_vm3, %v803_v28, 0 }
 0x1d1   : > { %875 = vmatpush.bf16.xpose.msrb.mxu1 %v866_v31 }
 0x1d3   : > { %1415 = vmatmul.msk.bf16.vlgmr.msra.gmra.mxu2 %vm804_vm3, %v790_v32 }
 0x1d5   : > { %1416 = vmatmul.msk.bf16.vlgmr.msra.gmra.mxu3 %vm804_vm3, %v793_v37 }
 0x1d6   : > { %1417 = vmatmul.msk.bf16.vlgmr.msrb.gmra.mxu0 %vm804_vm3, %v796_v38 }
 0x1d8   : > { %1418 = vmatmul.msk.bf16.vlgmr.msrb.gmra.mxu1 %vm804_vm3, %v799_v41 }
 0x253   : > { %v858_v42 = vpop.f32.mrf.mxu0 }
 0x254   : > { %v887_v43 = vsel %vm804_vm3, %v858_v42, -inf }
 0x255   : > { %v877_v44 = vpop.f32.mrf.mxu1  ;;  %888 = vmax.xlane.f32.xlu2 %v887_v43 }
 0x256   : > { %v820_v45 = vpop.f32.mrf.mxu2  ;;  %v890_v50 = vsel %vm804_vm3, %v877_v44, -inf }
 0x257   : > { %v881_v46 = vsel %vm804_vm3, %v820_v45, -inf }
 0x258   : > { %v839_v47 = vpop.f32.mrf.mxu3  ;;  %882 = vmax.xlane.f32.xlu0 %v881_v46 }
 0x259   : > { %v884_v48 = vsel %vm804_vm3, %v839_v47, -inf }
 0x25a   : > { %885 = vmax.xlane.f32.xlu1 %v884_v48 }
 0x25b   : > { %v860_v49 = vpop.f32.mrf.mxu0 }
 0x25d   : > { %v879_v51 = vpop.f32.mrf.mxu1  ;;  %891 = vmax.xlane.f32.xlu2 %v890_v50 }
 0x25e   : > { %v822_v52 = vpop.f32.mrf.mxu2 }
 0x260   : > { %v841_v53 = vpop.f32.mrf.mxu3 }
 0x26c   : > { %514 = vrot.lane.b32.xlu0 %v1933_v21, %s1765_s28 }
 0x273   : > { %510 = vrot.lane.b32.xlu1 %v1942_v35, %s1765_s28 }
 0x275   : > { %512 = vrot.lane.b32.xlu2 %v1931_v20, %s1765_s28  ;;  %s1654_s28 = scalar_lea.hbm %s1653_s22, 32 }
 0x276   : > { %p1655_p1 = scmp.ne.s32.totalorder %s1653_s22, %s1654_s28  ;;  %p1660_p11 = scmp.lt.s32.totalorder %s1658_s24, %s1654_s28 }
 0x278   : > { %p1656_p3 = pnand %p1655_p1, %p1876_p4  ;;  %p1661_p12 = por %p1660_p11, %p1659_p10 }
 0x27a   : > { %p1657_p9 = pneg %p1656_p3 }
 0x27c   : > { %p1662_p13 = pnand %p1661_p12, %p1657_p9 }
 0x2c8   : > { %v889_v55 = vpop.xlane.xlu2 %888 }
 0x2c9   : > { %v895_v56 = vsub.f32 %v858_v42, %v889_v55 }
 0x2cb   : > { %v901_v57 = vmul.f32 1.442695, %v895_v56  ;;  %v883_v58 = vpop.xlane.xlu0 %882 }
 0x2cc   : > { %v893_v59 = vsub.f32 %v820_v45, %v883_v58 }
 0x2cd   : > { %1532 = vpow2.f32 %v901_v57  ;;  %v886_v60 = vpop.xlane.xlu1 %885 }
 0x2ce   : > { %v897_v61 = vmul.f32 1.442695, %v893_v59  ;;  %v894_v62 = vsub.f32 %v839_v47, %v886_v60 }
 0x2d0   : > { %1534 = vpow2.f32 %v897_v61  ;;  %v899_v63 = vmul.f32 1.442695, %v894_v62  ;;  %v892_v0 = vpop.xlane.xlu2 %891 }
 0x2d1   : > { %v896_v21 = vsub.f32 %v877_v44, %v892_v0 }
 0x2d2   : > { %1536 = vpow2.f32 %v899_v63 }
 0x2d3   : > { %v2029_v1 = vpop.eup %1532  ;;  %v903_v35 = vmul.f32 1.442695, %v896_v21 }
 0x2d4   : > { %v911_v20 = vsel %vm804_vm3, %v2029_v1, 0.0 }
 0x2d5   : > { %912 = vadd.xlane.f32.xlu2 %v911_v20  ;;  %1538 = vpow2.f32 %v903_v35 }
 0x2d6   : > { %v2033_v2 = vpop.eup %1534 }
 0x2d7   : > { %v905_v3 = vsel %vm804_vm3, %v2033_v2, 0.0 }
 0x2d8   : > { %v2037_v4 = vpop.eup %1536  ;;  %906 = vadd.xlane.f32.xlu1 %v905_v3  ;;  %v513_v7 = vpop.permute.xlu2 %512 }
 0x2d9   : > { %v908_v5 = vsel %vm804_vm3, %v2037_v4, 0.0  ;;  %v525_v11 = vshrl.u32 %v513_v7, 16 }
 0x2da   : > { %909 = vadd.xlane.f32.xlu0 %v908_v5 }
 0x2db   : > { %v2041_v6 = vpop.eup %1538 }
 0x2dc   : > { %v914_v10 = vsel %vm804_vm3, %v2041_v6, 0.0 }
 0x2de   : > { %v515_v8 = vpop.permute.xlu0 %514 }
 0x2df   : > { %v526_v9 = vshrl.u32 %v515_v8, 16  ;;  %v524_v12 = vpack.i.b16 %v515_v8, %v513_v7 }
 0x2e0   : > { %915 = vadd.xlane.f32.xlu1 %v914_v10 }
 0x2e1   : > { %v527_v13 = vpack.i.b16 %v526_v9, %v525_v11  ;;  %v537_v14 = vperm.slane %v524_v12, %v1939_v27 }
 0x2e3   : > { %v563_v17 = vperm.slane %v527_v13, %v1939_v27  ;;  %v538_v22 = vrot.slane %v537_v14, 4 }
 0x2e5   : > { %v511_v15 = vpop.permute.xlu1 %510  ;;  %v564_v25 = vrot.slane %v563_v17, 4 }
 0x2e6   : > { %v518_v18 = vpack.i.b16 %v511_v15, %v509_v54  ;;  %v520_v19 = vshrl.u32 %v511_v15, 16 }
 0x2e8   : > { %v521_v23 = vpack.i.b16 %v520_v19, %v519_v16  ;;  %v532_v24 = vperm.slane %v518_v18, %v1939_v27 }
 0x2ea   : > { %v539_v26 = vsel %vm407_vm1, %v538_v22, %v532_v24  ;;  %v540_v28 = vrot.slane %v532_v24, 4  ;;  %v558_v29 = vperm.slane %v521_v23, %v1939_v27 }
 0x2eb   : > { %v545_v30 = vperm.slane %v539_v26, %v1947_v40 }
 0x2ec   : > { %v541_v31 = vsel %vm407_vm1, %v537_v14, %v540_v28  ;;  %v565_v32 = vsel %vm407_vm1, %v564_v25, %v558_v29  ;;  %v566_v33 = vrot.slane %v558_v29, 4 }
 0x2ed   : > { %v549_v34 = vperm.slane %v541_v31, %v1947_v40  ;;  %v571_v36 = vperm.slane %v565_v32, %v1947_v40  ;;  %v550_v38 = vrot.slane %v545_v30, 4 }
 0x2ee   : > { %v567_v37 = vsel %vm407_vm1, %v563_v17, %v566_v33 }
 0x2ef   : > { %v552_v39 = vrot.slane %v549_v34, 4  ;;  %v575_v41 = vperm.slane %v567_v37, %v1947_v40  ;;  %v576_v43 = vrot.slane %v571_v36, 4  ;;  %v551_v46 = vsel %vm407_vm1, 0, %v550_v38 }
 0x2f1   : > { %v553_v42 = vsel %vm407_vm1, 0, %v552_v39  ;;  %v578_v44 = vrot.slane %v575_v41, 4  ;;  %v580_v48 = vsel %vm407_vm1, %v552_v39, %v545_v30  ;;  %v577_v51 = vsel %vm407_vm1, 0, %v576_v43 }
 0x2f2   : > { %v585_v45 = vrot.slane %v553_v42, 4  ;;  %v584_v55 = vperm.slane %v580_v48, %v1939_v27 }
 0x2f3   : > { %v579_v47 = vsel %vm407_vm1, 0, %v578_v44  ;;  %v599_v53 = vsel %vm407_vm1, %v578_v44, %v571_v36 }
 0x2f4   : > { %v586_v49 = vsel %vm407_vm1, %v585_v45, %v551_v46  ;;  %v604_v50 = vrot.slane %v579_v47, 4  ;;  %v603_v59 = vperm.slane %v599_v53, %v1939_v27 }
 0x2f5   : > { %v590_v52 = vperm.slane %v586_v49, %v1939_v27 }
 0x2f6   : > { %v605_v54 = vsel %vm407_vm1, %v604_v50, %v577_v51 }
 0x2f7   : > { %v591_v56 = vrot.slane %v590_v52, 4  ;;  %v609_v57 = vperm.slane %v605_v54, %v1939_v27 }
 0x2f9   : > { %v592_v58 = vsel %vm407_vm1, %v591_v56, %v584_v55  ;;  %v610_v60 = vrot.slane %v609_v57, 4 }
 0x2fa   : > { %v596_v61 = vperm.slane %v592_v58, %v1947_v40 }
 0x2fb   : > { %v611_v62 = vsel %vm407_vm1, %v610_v60, %v603_v59 }
 0x2fc   : > { %v597_v63 = vrot.slane %v596_v61, 4  ;;  %v615_v0 = vperm.slane %v611_v62, %v1947_v40  ;;  %v622_v21 = vshrl.u32 %v596_v61, 16 }
 0x2fe   : > { %v598_v35 = vsel %vm407_vm1, 0, %v597_v63  ;;  %v616_v20 = vrot.slane %v615_v0, 4  ;;  %v620_v3 = vpack.i.b16 %v615_v0, %v596_v61  ;;  %v623_v5 = vshrl.u32 %v615_v0, 16 }
 0x2ff   : > { %v630_v10 = vshrl.u32 %v598_v35, 16 }
 0x300   : > { %v617_v7 = vsel %vm407_vm1, 0, %v616_v20  ;;  %v624_v8 = vpack.i.b16 %v623_v5, %v622_v21  ;;  %634 = vst.msk [vmem:[#allocation3] sm:$0xf] %vm503_vm2, %v620_v3 }
 0x301   : > { %v628_v9 = vpack.i.b16 %v617_v7, %v598_v35  ;;  %v631_v11 = vshrl.u32 %v617_v7, 16 }
 0x302   : > { %635 = vst.msk [vmem:[#allocation3 + $0x4] sm:$0xf] %vm503_vm2, %v624_v8 }
 0x303   : > { %v632_v12 = vpack.i.b16 %v631_v11, %v630_v10  ;;  %636 = vst.msk [vmem:[#allocation3 + $0x8] sm:$0xf] %vm503_vm2, %v628_v9 }
 0x305   : > { %637 = vst.msk [vmem:[#allocation3 + $0xc] sm:$0xf] %vm503_vm2, %v632_v12 }
 0x307   : > { %v985_v13 = vld [vmem:[#allocation3] sm:$0xf] }
 0x308   : > { %v994_v14 = vsel %vm992_vm4, %v985_v13, 0 }
 0x309   : > { %1003 = vmatpush.bf16.msrb.mxu2 %v994_v14  ;;  %v986_v15 = vld [vmem:[#allocation3 + $0x4] sm:$0xf] }
 0x30a   : > { %v1013_v16 = vsel %vm992_vm4, %v986_v15, 0  ;;  %v987_v17 = vld [vmem:[#allocation3 + $0x8] sm:$0xf] }
 0x30b   : > { %1022 = vmatpush.bf16.msrb.mxu3 %v1013_v16  ;;  %v1032_v18 = vsel %vm992_vm4, %v987_v17, 0 }
 0x30c   : > { %1041 = vmatpush.bf16.msra.mxu0 %v1032_v18  ;;  %v988_v19 = vld [vmem:[#allocation3 + $0xc] sm:$0xf] }
 0x30d   : > { %v1051_v22 = vsel %vm992_vm4, %v988_v19, 0 }
 0x30e   : > { %1060 = vmatpush.bf16.msra.mxu1 %v1051_v22 }
 0x348   : > { %v913_v23 = vpop.xlane.xlu2 %912 }
 0x349   : > { %1540 = vrcp.f32 %v913_v23  ;;  %v956_v31 = vand.u32 2147483647, %v913_v23  ;;  %v958_v32 = vand.u32 2147483648, %v913_v23  ;;  %vm952_vm6 = vweird.f32 %v913_v23 }
 0x34b   : > { %v907_v24 = vpop.xlane.xlu1 %906  ;;  %vm957_vm7 = vcmp.eq.f32.partialorder %v956_v31, 8.507059e+37  ;;  %v959_v44 = vor.u32 1.1754944e-38, %v958_v32 }
 0x34c   : > { %1542 = vrcp.f32 %v907_v24  ;;  %v926_v42 = vand.u32 2147483647, %v907_v24  ;;  %v928_v43 = vand.u32 2147483648, %v907_v24  ;;  %vm922_vm10 = vweird.f32 %v907_v24 }
 0x34d   : > { %v910_v25 = vpop.xlane.xlu0 %909 }
 0x34e   : > { %1544 = vrcp.f32 %v910_v25  ;;  %v941_v48 = vand.u32 2147483647, %v910_v25  ;;  %v943_v49 = vand.u32 2147483648, %v910_v25  ;;  %vm927_vm13 = vcmp.eq.f32.partialorder %v926_v42, 8.507059e+37 }
 0x34f   : > { %v1541_v26 = vpop.eup %1540  ;;  %v929_v55 = vor.u32 1.1754944e-38, %v928_v43  ;;  %vm937_vm14 = vweird.f32 %v910_v25 }
 0x350   : > { %v948_v28 = vmul.f32 %v1541_v26, %v913_v23  ;;  %vm953_vm5 = vweird.f32 %v1541_v26  ;;  %v944_v59 = vor.u32 1.1754944e-38, %v943_v49  ;;  %vm942_vm2 = vcmp.eq.f32.partialorder %v941_v48, 8.507059e+37 }
 0x351   : > { %vm954_vm8 = vmor %vm952_vm6, %vm953_vm5 }
 0x352   : > { %v1543_v29 = vpop.eup %1542  ;;  %v949_v30 = vsub.f32 1.0, %v948_v28 }
 0x353   : > { %v918_v33 = vmul.f32 %v1543_v29, %v907_v24  ;;  %v2079_v34 = vpop.xlane.xlu1 %915  ;;  %vm923_vm9 = vweird.f32 %v1543_v29 }
 0x354   : > { %v1545_v36 = vpop.eup %1544  ;;  %v950_v37 = vmul.f32 %v1541_v26, %v949_v30  ;;  %1546 = vrcp.f32 %v2079_v34  ;;  %vm924_vm12 = vmor %vm922_vm10, %vm923_vm9  ;;  %v971_v0 = vand.u32 2147483647, %v2079_v34  ;;  %v973_v21 = vand.u32 2147483648, %v2079_v34 }
 0x355   : > { %v919_v38 = vsub.f32 1.0, %v918_v33  ;;  %v933_v39 = vmul.f32 %v1545_v36, %v910_v25  ;;  %vm938_vm11 = vweird.f32 %v1545_v36  ;;  %vm967_vm5 = vweird.f32 %v2079_v34 }
 0x356   : > { %v951_v41 = vadd.f32 %v1541_v26, %v950_v37  ;;  %vm939_vm15 = vmor %vm937_vm14, %vm938_vm11  ;;  %v974_v8 = vor.u32 1.1754944e-38, %v973_v21 }
 0x357   : > { %v920_v45 = vmul.f32 %v1543_v29, %v919_v38  ;;  %v934_v46 = vsub.f32 1.0, %v933_v39 }
 0x358   : > { %v955_v47 = vsel %vm954_vm8, %v1541_v26, %v951_v41 }
 0x359   : > { %v960_v50 = vsel %vm957_vm7, %v959_v44, %v955_v47  ;;  %v921_v51 = vadd.f32 %v1543_v29, %v920_v45  ;;  %v935_v52 = vmul.f32 %v1545_v36, %v934_v46  ;;  %vm972_vm7 = vcmp.eq.f32.partialorder %v971_v0, 8.507059e+37 }
 0x35a   : > { %v1547_v53 = vpop.eup %1546  ;;  %v961_v54 = vmul.f32 %v2029_v1, %v960_v50 }
 0x35b   : > { %v925_v56 = vsel %vm924_vm12, %v1543_v29, %v921_v51  ;;  %v936_v57 = vadd.f32 %v1545_v36, %v935_v52  ;;  %v963_v58 = vmul.f32 %v1547_v53, %v2079_v34  ;;  %vm968_vm4 = vweird.f32 %v1547_v53 }
 0x35c   : > { %979 = vst.msk [vmem:[%s2085_s7 + $0x10] sm:$0xff] %vm804_vm3, %v961_v54  ;;  %v983_v60 = vpack.c.bf16 %v961_v54, %v961_v54  ;;  %v930_v61 = vsel %vm927_vm13, %v929_v55, %v925_v56  ;;  %vm969_vm6 = vmor %vm967_vm5, %vm968_vm4 }
 0x35d   : > { %v940_v62 = vsel %vm939_vm15, %v1545_v36, %v936_v57  ;;  %v964_v1 = vsub.f32 1.0, %v963_v58  ;;  %v931_v63 = vmul.f32 %v2033_v2, %v930_v61 }
 0x35e   : > { %1421 = vmatmul.msk.bf16.vlgmr.msra.gmra.mxu0 %vm804_vm3, %v983_v60  ;;  %v945_v35 = vsel %vm942_vm2, %v944_v59, %v940_v62 }
 0x35f   : > { %v965_v20 = vmul.f32 %v1547_v53, %v964_v1  ;;  %977 = vst.msk [vmem:[%s2085_s7] sm:$0xff] %vm804_vm3, %v931_v63  ;;  %v981_v3 = vpack.c.bf16 %v931_v63, %v931_v63  ;;  %v946_v5 = vmul.f32 %v2037_v4, %v945_v35 }
 0x361   : > { %v966_v7 = vadd.f32 %v1547_v53, %v965_v20  ;;  %1419 = vmatmul.msk.bf16.vlgmr.msrb.gmra.mxu2 %vm804_vm3, %v981_v3  ;;  %978 = vst.msk [vmem:[%s2085_s7 + $0x8] sm:$0xff] %vm804_vm3, %v946_v5  ;;  %v982_v2 = vpack.c.bf16 %v946_v5, %v946_v5 }
 0x363   : > { %v970_v9 = vsel %vm969_vm6, %v1547_v53, %v966_v7  ;;  %1420 = vmatmul.msk.bf16.vlgmr.msrb.gmra.mxu3 %vm804_vm3, %v982_v2 }
 0x364   : > { %v975_v10 = vsel %vm972_vm7, %v974_v8, %v970_v9 }
 0x365   : > { %v976_v11 = vmul.f32 %v2041_v6, %v975_v10 }
 0x367   : > { %980 = vst.msk [vmem:[%s2085_s7 + $0x18] sm:$0xff] %vm804_vm3, %v976_v11  ;;  %v984_v4 = vpack.c.bf16 %v976_v11, %v976_v11 }
 0x369   : > { %1422 = vmatmul.msk.bf16.vlgmr.msra.gmra.mxu1 %vm804_vm3, %v984_v4 }
 0x3db   : > { %v1043_v12 = vpop.f32.mrf.mxu0 }
 0x3dc   : > { %v1066_v13 = vrot.slane %v1043_v12, 4 }
 0x3e3   : > { %v1045_v14 = vpop.f32.mrf.mxu0 }
 0x3e4   : > { %v1005_v15 = vpop.f32.mrf.mxu2 }
 0x3e5   : > { %v1068_v16 = vsel %vm407_vm1, %v1066_v13, %v1005_v15  ;;  %v1069_v17 = vrot.slane %v1005_v15, 4 }
 0x3e6   : > { %v1074_v18 = vperm.slane %v1068_v16, %v1939_v27  ;;  %v1024_v19 = vpop.f32.mrf.mxu3  ;;  %v1062_v22 = vpop.f32.mrf.mxu1 }
 0x3e7   : > { %v1070_v23 = vsel %vm407_vm1, %v1043_v12, %v1069_v17  ;;  %v1081_v24 = vrot.slane %v1024_v19, 4  ;;  %v1079_v6 = vrot.slane %v1062_v22, 4 }
 0x3e8   : > { %v1078_v25 = vperm.slane %v1070_v23, %v1939_v27  ;;  %v1093_v29 = vrot.slane %v1074_v18, 4 }
 0x3e9   : > { %v1080_v26 = vsel %vm407_vm1, %v1079_v6, %v1024_v19  ;;  %v1082_v28 = vsel %vm407_vm1, %v1062_v22, %v1081_v24 }
 0x3ea   : > { %v1105_v30 = vrot.slane %v1078_v25, 4  ;;  %v1086_v31 = vperm.slane %v1080_v26, %v1939_v27  ;;  %v1090_v32 = vperm.slane %v1082_v28, %v1939_v27 }
 0x3ec   : > { %v1091_v33 = vrot.slane %v1086_v31, 4  ;;  %v1094_v34 = vsel %vm407_vm1, %v1086_v31, %v1093_v29  ;;  %v1103_v36 = vrot.slane %v1090_v32, 4  ;;  %v1106_v37 = vsel %vm407_vm1, %v1090_v32, %v1105_v30  ;;  %v1007_v38 = vpop.f32.mrf.mxu2 }
 0x3ed   : > { %v1102_v39 = vperm.slane %v1094_v34, %v1947_v40  ;;  %v1114_v41 = vperm.slane %v1106_v37, %v1947_v40 }
 0x3ee   : > { %v1092_v42 = vsel %vm407_vm1, %v1091_v33, %v1074_v18  ;;  %v1104_v43 = vsel %vm407_vm1, %v1103_v36, %v1078_v25  ;;  %v1026_v44 = vpop.f32.mrf.mxu3  ;;  %v1064_v45 = vpop.f32.mrf.mxu1 }
 0x3ef   : > { %v1098_v46 = vperm.slane %v1092_v42, %v1947_v40  ;;  %v1110_v47 = vperm.slane %v1104_v43, %v1947_v40  ;;  %v1117_v48 = vrot.slane %v1102_v39, 4  ;;  %v1121_v49 = vrot.slane %v1114_v41, 4 }
 0x3f1   : > { %v1115_v50 = vrot.slane %v1098_v46, 4  ;;  %v1118_v51 = vsel %vm407_vm1, 0.0, %v1117_v48  ;;  %v1119_v52 = vrot.slane %v1110_v47, 4  ;;  %v1122_v53 = vsel %vm407_vm1, 0.0, %v1121_v49 }
 0x3f2   : > { %v1128_v54 = vrot.slane %v1118_v51, 4  ;;  %v1134_v55 = vsel %vm407_vm1, %v1121_v49, %v1110_v47  ;;  %v1139_v56 = vrot.slane %v1122_v53, 4  ;;  %v1123_v57 = vsel %vm407_vm1, %v1117_v48, %v1098_v46 }
 0x3f3   : > { %v1120_v58 = vsel %vm407_vm1, 0.0, %v1119_v52  ;;  %v1116_v59 = vsel %vm407_vm1, 0.0, %v1115_v50  ;;  %v1127_v60 = vperm.slane %v1123_v57, %v1939_v27  ;;  %v1138_v61 = vperm.slane %v1134_v55, %v1939_v27 }
 0x3f4   : > { %v1129_v62 = vsel %vm407_vm1, %v1128_v54, %v1116_v59  ;;  %v1140_v1 = vsel %vm407_vm1, %v1139_v56, %v1120_v58 }
 0x3f5   : > { %v1133_v63 = vperm.slane %v1129_v62, %v1939_v27  ;;  %v1144_v0 = vperm.slane %v1140_v1, %v1939_v27  ;;  %v1147_v21 = vrot.slane %v1127_v60, 4  ;;  %v1159_v35 = vrot.slane %v1138_v61, 4 }
 0x3f7   : > { %v1148_v20 = vsel %vm407_vm1, %v1133_v63, %v1147_v21  ;;  %v1160_v3 = vsel %vm407_vm1, %v1144_v0, %v1159_v35  ;;  %v1145_v5 = vrot.slane %v1133_v63, 4  ;;  %v1157_v7 = vrot.slane %v1144_v0, 4 }
 0x3f8   : > { %v1156_v2 = vperm.slane %v1148_v20, %v1947_v40  ;;  %v1168_v8 = vperm.slane %v1160_v3, %v1947_v40 }
 0x3f9   : > { %v1146_v9 = vsel %vm407_vm1, %v1145_v5, %v1127_v60  ;;  %v1158_v10 = vsel %vm407_vm1, %v1157_v7, %v1138_v61 }
 0x3fa   : > { %v1175_v11 = vrot.slane %v1156_v2, 4  ;;  %v1173_v27 = vrot.slane %v1168_v8, 4  ;;  %v1152_v4 = vperm.slane %v1146_v9, %v1947_v40  ;;  %v1164_v12 = vperm.slane %v1158_v10, %v1947_v40 }
 0x3fc   : > { %v1176_v13 = vsel %vm407_vm1, %v1168_v8, %v1175_v11  ;;  %v1174_v14 = vsel %vm407_vm1, %v1173_v27, %v1156_v2  ;;  %v1169_v15 = vrot.slane %v1164_v12, 4  ;;  %v1171_v16 = vrot.slane %v1152_v4, 4 }
 0x3fd   : > { %1186 = vrot.lane.b32.xlu1 %v1176_v13, %s1771_s17  ;;  %1182 = vrot.lane.b32.xlu2 %v1174_v14, %s1772_s2 }
 0x3fe   : > { %v1172_v40 = vsel %vm407_vm1, %v1164_v12, %v1171_v16  ;;  %v1170_v17 = vsel %vm407_vm1, %v1169_v15, %v1152_v4 }
 0x3ff   : > { %1665 = shalt.err (!%p1662_p13)
}
 0x400   : > { %s1773_s25 = smov 128   ;;  %s1774_s30 = smov 8   ;;  %vm1190_vm1 = vcmask 130048   ;;  %vm1192_vm8 = vcmask 195584  }
 0x401   : > { %1444 = dma.vmem_to_hbm [thread:$0]  (%p1876_p4), %s2146_s26, 512, %s1232_s29, %s1201_s20, %s1773_s25, %s1773_s25, %s1774_s30  }
 0x402   : > { %1178 = vrot.lane.b32.xlu0 %v1172_v40, %s1774_s30  ;;  %s1395_s6 = sshll.u32 %s1902_s11, 3  ;;  %s1425_s7 = sshll.u32 %s1752_s21, 3 }
 0x403   : > { %s1212_s13 = scalar_lea.hbm %s2209_s4, %s1425_s7  ;;  %s319_s27 = scalar_lea.vmem [#allocation10], %s1395_s6 }
 0x404   : > { %s1214_s17 = sshll.u32 %s319_s27, 4  ;;  %s1216_s2 = sshll.u32 %s1212_s13, 4  ;;  %s1215_s17 = int_to_ptr.vmem [resolvable:$true] %s1214_s17  ;;  %s1217_s2 = int_to_ptr.hbm [resolvable:$true] %s1216_s2 }
 0x405   : > { %s1196_s21 = scalar_lea.sflag [#allocation6], %s1902_s11  ;;  %s1680_s26 = sshra.s32 %s1217_s2, 4  ;;  %s1681_s26 = int_to_ptr.hbm [resolvable:$true] %s1680_s26 }
 0x406   : > { %s1682_s29 = scalar_lea.hbm %s1681_s26, 8  ;;  %s1686_s28 = scalar_lea.hbm %s2209_s4, 16 }
 0x407   : > { %p1683_p0 = scmp.ne.s32.totalorder %s1681_s26, %s1682_s29  ;;  %p1687_p8 = scmp.lt.s32.totalorder %s1681_s26, %s2209_s4 }
 0x408   : > { %p1688_p1 = scmp.lt.s32.totalorder %s1686_s28, %s1682_s29 }
 0x409   : > { %p1684_p2 = pnand %p1683_p0, %p1876_p4 }
 0x40a   : > { %p1689_p3 = por %p1688_p1, %p1687_p8 }
 0x40b   : > { %p1685_p5 = pneg %p1684_p2 }
 0x40d   : > { %p1690_p9 = pnand %p1689_p3, %p1685_p5 }
 0x457   : > { %v1183_v19 = vpop.permute.xlu2 %1182 }
 0x46f   : > { %v1187_v23 = vpop.permute.xlu1 %1186 }
 0x474   : > { %v1179_v18 = vpop.permute.xlu0 %1178 }
 0x475   : > { %v1189_v22 = vsel %vm804_vm3, %v1170_v17, %v1179_v18 }
 0x476   : > { %v1191_v24 = vsel %vm1190_vm1, %v1189_v22, %v1183_v19 }
 0x477   : > { %v1193_v6 = vsel %vm1192_vm8, %v1191_v24, %v1187_v23 }
 0x478   : > { %1194 = vst.msk [vmem:[%s319_s27] sm:$0xff] %vm359_vm0, %v1193_v6 }
 0x479   : > { %1693 = shalt.err (!%p1690_p9)
}
 0x47a   : > { %1443 = dma.vmem_to_hbm [thread:$0]  (%p1876_p4), %s1215_s17, 128, %s1217_s2, %s1196_s21  }
 0x47b PF: > { %s1246_s24 = sand.u32 1, %s1740_s18   ;;  %p1459_p10 = pnand %p1386_p6, %p1884_p7 }
 0x47c   : > { %s1247_s15 = scalar_lea.sflag [#allocation6], %s1246_s24 }
 0x47d   : > { %p1460_p11 = pneg %p1459_p10 }
 0x47f   : > { %1731 = dma.done.wait (%p1460_p11), %s1247_s15, 128  }
 0x480   : > { %1733 = vsyncadd (%p1460_p11), %s1247_s15, 4294967168  ;;  %s1257_s16 = scalar_lea.sflag [#allocation12], %s1246_s24 }
 0x481   : > { %1735 = dma.done.wait (%p1460_p11), %s1257_s16, 512  }
 0x482   : > { %1737 = vsyncadd (%p1460_p11), %s1257_s16, 4294966784  ;;  %s28_s23 = sadd.s32 1, %s1760_s23   ;;  %s2228_s14 = sld [smem:[#allocation18_spill]] }
 0x483   : > { %p25_p12 = scmp.ge.s32.totalorder %s28_s23, 4   ;;  %s2229_s20 = sld [smem:[#allocation21_spill]] }
 0x484   : > { %s2230_s21 = sld [smem:[#allocation19_spill]]  ;;  %s2232_s18 = smov %s1744_s19 }
 0x485   : > { %s2231_s22 = sld [smem:[#allocation20_spill]]  ;;  %27 = sbr.rel (!%p25_p12) target bundleno = 12 (0xc), region = 119 }
 0x488   : > { %s2233_s19 = smov %s2228_s14 }
 0x48a   :  { %1263 = vsyncpa [#allocation5], 1 }
 0x48b   :  { %1265 = vsyncpa [#allocation5 + $0x1], 1 }
 0x48c   :  { %1266 = vsyncpa [#allocation8], 1 }
 0x48d   :  { %1268 = vsyncpa [#allocation8 + $0x1], 1 }
 0x48e   :  { %1269 = vsyncpa [#allocation6], 1 }
 0x48f   :  { %1271 = vsyncpa [#allocation6 + $0x1], 1 }
 0x490   :  { %1272 = vsyncpa [#allocation12], 1 }
 0x491   :  { %1274 = vsyncpa [#allocation12 + $0x1], 1 }

</bundles_post_ra>
